<compile_context>
chip_gen: v6e
topology: v6e:2x2x1
jax: 0.10.0
libtpu: 0.0.40
codegen_flags: <defaults>
</compile_context>

<pallas_src>
import jax
import jax.numpy as jnp
from jax import lax
from jax.experimental import pallas as pl
from jax.experimental.pallas import tpu as pltpu


def _l2norm_kernel(x_ref, o_ref, *, eps):
    # Whole tile: (tm, D). Sum-of-squares accumulated in f32 for accuracy.
    xf = x_ref[...].astype(jnp.float32)
    sq = jnp.sum(xf * xf, axis=-1, keepdims=True)            # (tm, 1) XLU reduce
    # 1 / max(||x||, eps) == min(rsqrt(sq), 1/eps); zero rows (inf) clamp to 1/eps.
    inv = jnp.minimum(lax.rsqrt(sq), jnp.float32(1.0 / eps))  # EUP rsqrt (free slot)
    if jnp.dtype(o_ref.dtype) == jnp.dtype(jnp.float32):
        o_ref[...] = xf * inv                                  # one broadcast VALU mul
    else:
        # bf16/fp8: scale the native-dtype tile so the f32 upcast is dead after
        # the reduce (less live scratch, bf16 VALU mul on v6e/v7x).
        o_ref[...] = (x_ref[...] * inv.astype(o_ref.dtype)).astype(o_ref.dtype)


def _round_up(a, b):
    return ((a + b - 1) // b) * b


def _cdiv(a, b):
    return -(-a // b)


def _vmem_config():
    """Generation-aware (block_budget_bytes, vmem_limit_bytes)."""
    try:
        cap = int(pltpu.get_tpu_info().vmem_capacity_bytes)
    except Exception:
        cap = 64 * 1024 * 1024  # conservative: assume the smallest (v7x-like)
    if cap <= 64 * 1024 * 1024:
        # v7x: 64 MiB physical, 2 TCs per chip -> stay well under half.
        return 24 * 1024 * 1024, 48 * 1024 * 1024
    # v5e / v6e: 128 MiB physical.
    return 16 * 1024 * 1024, 64 * 1024 * 1024


def _pick_row_tile(N, D, itemsize, block_budget):
    """Largest row tile whose resident VMEM (double-buffered in+out blocks plus
    in-kernel f32 scratch) fits the budget, rounded to the dtype's sublane
    packing, while keeping ~>=8 grid steps when N allows (v7x dual-TC +
    pipelining)."""
    pack = max(8, 32 // max(itemsize, 1))        # 8 f32, 16 bf16, 32 int8/fp8
    # Per tile row: 2x input + 2x output buffers + ~2 rows of f32 scratch.
    bytes_per_row = D * (4 * itemsize + 8)
    tm_budget = max(pack, ((block_budget // max(bytes_per_row, 1)) // pack) * pack)
    tm_steps = _round_up(max(_cdiv(N, 8), 1), pack)
    return max(pack, min(tm_budget, tm_steps)), bytes_per_row, pack


def l2_normalize(x, dim=-1, eps=1e-12, tm=None):
    """Pallas implementation of F.normalize(x, p=2, dim=dim, eps=eps)."""
    ndim = x.ndim
    if dim < 0:
        dim += ndim
    perm = None
    if dim != ndim - 1:
        # TODO(synk): reduce along the sublane axis directly instead of paying
        # two extra HBM passes each way for the transpose round-trip.
        perm = list(range(ndim))
        perm[dim], perm[ndim - 1] = perm[ndim - 1], perm[dim]
        x = jnp.transpose(x, perm)

    orig_shape = x.shape
    D = int(orig_shape[-1])
    N = 1
    for s in orig_shape[:-1]:
        N *= int(s)
    x2d = x.reshape(N, D)

    itemsize = jnp.dtype(x2d.dtype).itemsize
    block_budget, vmem_limit = _vmem_config()
    tm_auto, bytes_per_row, pack = _pick_row_tile(N, D, itemsize, block_budget)
    if tm is None:
        tm = tm_auto
    else:
        tm = max(pack, (tm // pack) * pack)

    if bytes_per_row * pack > vmem_limit:
        # TODO(synk): D-tiled two-pass path for rows that don't fit VMEM.
        raise NotImplementedError(
            f"last dim {D} too large for single-pass VMEM tiling "
            f"(needs {bytes_per_row * pack} B > {vmem_limit} B)")

    # Ragged last block instead of pad+slice: computation is strictly row-local
    # (garbage OOB rows only affect themselves) and OOB stores are masked.
    grid = _cdiv(N, tm)

    out2d = pl.pallas_call(
        lambda x_ref, o_ref: _l2norm_kernel(x_ref, o_ref, eps=float(eps)),
        out_shape=jax.ShapeDtypeStruct((N, D), x2d.dtype),
        grid_spec=pltpu.PrefetchScalarGridSpec(
            num_scalar_prefetch=0,
            grid=(grid,),
            in_specs=[pl.BlockSpec((tm, D), lambda i: (i, 0))],
            out_specs=pl.BlockSpec((tm, D), lambda i: (i, 0)),
        ),
        compiler_params=pltpu.CompilerParams(
            dimension_semantics=("parallel",),
            vmem_limit_bytes=int(vmem_limit)),
    )(x2d)

    out = out2d.reshape(orig_shape)
    if perm is not None:
        out = jnp.transpose(out, perm)  # perm is its own inverse
    return out


class L2NormalizationLayer:
    """JAX/Pallas equivalent of the PyTorch module (no parameters)."""

    def __init__(self, dim=-1, eps=1e-12):
        self.dim = dim
        self.eps = eps

    def __call__(self, x):
        return l2_normalize(x, dim=self.dim, eps=self.eps)


def _ref_l2norm(x, eps=1e-12):
    x32 = x.astype(jnp.float32)
    norm = jnp.sqrt(jnp.sum(x32 * x32, axis=-1, keepdims=True))
    return (x32 / jnp.maximum(norm, eps)).astype(x.dtype)


if __name__ == "__main__":
    key = jax.random.PRNGKey(0)
    layer = L2NormalizationLayer(dim=-1, eps=1e-12)

    # 1) Embedding-like 2D input [batch, hidden].
    k1, k2, k3 = jax.random.split(key, 3)
    x1 = jax.random.normal(k1, (8, 128), dtype=jnp.float32)
    out1 = jax.block_until_ready(layer(x1))
    assert out1.shape == x1.shape and out1.dtype == x1.dtype
    assert jnp.max(jnp.abs(out1 - _ref_l2norm(x1))) < 1e-5

    # 2) 3D input with ragged row count (exercises the masked ragged last block
    #    and the zero-row eps-clamp path).
    x2 = jax.random.normal(k2, (3, 5, 32), dtype=jnp.float32)
    x2 = x2.at[0, 0].set(0.0)
    out2 = jax.block_until_ready(layer(x2))
    assert out2.shape == x2.shape and out2.dtype == x2.dtype
    assert jnp.max(jnp.abs(out2 - _ref_l2norm(x2))) < 1e-5

    # 3) bf16 input (exercises native-dtype scaling path + ragged grid).
    x3 = jax.random.normal(k3, (40, 256), dtype=jnp.float32).astype(jnp.bfloat16)
    out3 = jax.block_until_ready(layer(x3))
    assert out3.shape == x3.shape and out3.dtype == x3.dtype
    err3 = jnp.max(jnp.abs(out3.astype(jnp.float32) -
                           _ref_l2norm(x3).astype(jnp.float32)))
    assert err3 < 3e-2

    print("KERNEL_OK")
</pallas_src>

<mosaic_0001>
module attributes {stable_mosaic.version = 11 : i64} {
  func.func @_lambda_(%arg0: i32, %arg1: memref<8x128xf32, #tpu.memory_space<vmem>>, %arg2: memref<8x128xf32, #tpu.memory_space<vmem>>) attributes {dimension_semantics = [#tpu.dimension_semantics<parallel>], iteration_bounds = array<i64: 1>, scalar_prefetch = 0 : i64, scratch_operands = 0 : i64, tpu.core_type = #tpu.core_type<tc>, window_params = [{transform_indices = @transform_0, window_bounds = array<i64: 8, 128>}, {transform_indices = @transform_1, window_bounds = array<i64: 8, 128>}]} {
    %c0 = arith.constant 0 : index
    %c0_0 = arith.constant 0 : index
    %0 = vector.load %arg1[%c0, %c0_0] : memref<8x128xf32, #tpu.memory_space<vmem>>, vector<8x128xf32>
    %1 = arith.mulf %0, %0 : vector<8x128xf32>
    %cst = arith.constant dense<0.000000e+00> : vector<8xf32>
    %2 = vector.multi_reduction <add>, %1, %cst [1] : vector<8x128xf32> to vector<8xf32>
    %3 = vector.shape_cast %2 : vector<8xf32> to vector<8x1xf32>
    %4 = math.rsqrt %3 : vector<8x1xf32>
    %cst_1 = arith.constant 9.99999995E+11 : f32
    %5 = vector.broadcast %cst_1 : f32 to vector<8x1xf32>
    %6 = arith.minimumf %4, %5 : vector<8x1xf32>
    %7 = vector.broadcast %6 : vector<8x1xf32> to vector<8x128xf32>
    %8 = arith.mulf %0, %7 : vector<8x128xf32>
    %c0_2 = arith.constant 0 : index
    %c0_3 = arith.constant 0 : index
    %9 = vector.load %arg2[%c0_2, %c0_3] : memref<8x128xf32, #tpu.memory_space<vmem>>, vector<8x128xf32>
    tpu.vector_store %arg2[%c0_2, %c0_3], %8 {strides = array<i32>} : memref<8x128xf32, #tpu.memory_space<vmem>>, vector<8x128xf32>,
    return
  }
  func.func @transform_0(%arg0: i32) -> (i32, i32) {
    %c0_i32 = arith.constant 0 : i32
    %c0_i32_0 = arith.constant 0 : i32
    return %arg0, %c0_i32 : i32, i32
  }
  func.func @transform_1(%arg0: i32) -> (i32, i32) {
    %c0_i32 = arith.constant 0 : i32
    %c0_i32_0 = arith.constant 0 : i32
    return %arg0, %c0_i32 : i32, i32
  }
}

</mosaic_0001>

<bundles_post_ra>
// kernel: tpu_custom_call.1
= control target key start
LH: loop header
LB: loop body
LE: loop exit
PB: predicated region body
PF: predicated region fallthrough
CT: control target
= control target key end

     0   :  { %6 = vsyncpa [#allocation3], 0  ;;  %s110_s0 = inlined_call_operand.hbm [shape: f32[8,128], index: 0, kind: input, shape index: {}]   ;;  %s111_s1 = inlined_call_operand.hbm [shape: f32[8,128], index: 1, kind: output, shape index: {}]  }
   0x1   :  { %7 = vsyncpa [#allocation4], 0  ;;  %s92_s6 = smov [#allocation2]  }
   0x2   :  { %s14_s7 = sshll.u32 %s92_s6, 4  ;;  %s15_s7 = int_to_ptr.vmem [resolvable:$true] %s14_s7 }
   0x3   :  { %s56_s8 = scalar_lea.vmem %s15_s7, 128  ;;  %p61_p1 = scmp.lt.s32.totalorder %s15_s7, %s15_s7 }
   0x4   :  { %p57_p0 = scmp.ne.s32.totalorder %s15_s7, %s56_s8  ;;  %p62_p2 = scmp.lt.s32.totalorder %s56_s8, %s56_s8 }
   0x6   :  { %p63_p3 = por %p62_p2, %p61_p1 }
   0x8   :  { %p64_p4 = pnand %p63_p3, %p57_p0 }
   0xa   :  { %67 = shalt.err (!%p64_p4)
}
   0xb   :  { %17 = dma.hbm_to_vmem [thread:$0]  %s110_s0, 128, %s15_s7, [#allocation3]  }
   0xc   :  { %88 = dma.done.wait [#allocation3], 128  }
   0xd   :  { %89 = vsyncadd [#allocation3], 4294967168  ;;  %v21_v0 = vld [vmem:[#allocation2] sm:$0xff]  ;;  %s93_s11 = smov [#allocation5]  }
   0xe   :  { %v22_v1 = vmul.f32 %v21_v0, %v21_v0  ;;  %s35_s12 = sshll.u32 %s93_s11, 4  ;;  %s36_s12 = int_to_ptr.vmem [resolvable:$true] %s35_s12 }
   0xf   :  { %s68_s13 = scalar_lea.vmem %s36_s12, 128  ;;  %p73_p6 = scmp.lt.s32.totalorder %s36_s12, %s36_s12 }
  0x10   :  { %23 = vadd.xlane.f32.xlu0 %v22_v1  ;;  %p69_p5 = scmp.ne.s32.totalorder %s36_s12, %s68_s13  ;;  %p74_p7 = scmp.lt.s32.totalorder %s68_s13, %s68_s13 }
  0x12   :  { %p75_p8 = por %p74_p7, %p73_p6 }
  0x14   :  { %p76_p9 = pnand %p75_p8, %p69_p5 }
  0x99   :  { %v24_v2 = vpop.xlane.xlu0 %23 }
  0x9a   :  { %46 = vrsqrt.f32 %v24_v2 }
  0xa7   :  { %v47_v3 = vpop.eup %46 }
  0xa8   :  { %v26_v4 = vmin.f32 %v47_v3, 1e+12 }
  0xaa   :  { %v27_v5 = vmul.f32 %v26_v4, %v21_v0 }
  0xac   :  { %28 = vst [vmem:[#allocation5] sm:$0xff] %v27_v5 }
  0xad   :  { %79 = shalt.err (!%p76_p9)
}
  0xae   :  { %38 = dma.vmem_to_hbm [thread:$0]  %s36_s12, 128, %s111_s1, [#allocation4]  }
  0xaf   :  { %90 = dma.done.wait [#allocation4], 128  }
  0xb0   :  { %91 = vsyncadd [#allocation4], 4294967168 }
  0xb1   :  { %42 = vsyncpa [#allocation3], 1 }
  0xb2   :  { %43 = vsyncpa [#allocation4], 1 }

</bundles_post_ra>
